<compile_context>
chip_gen: v5e
topology: v5e:2x2
jax: 0.10.0
libtpu: 0.0.40
codegen_flags: <defaults>
</compile_context>

<pallas_src>
import numpy as np
import jax
import jax.numpy as jnp
from jax import lax
from jax.experimental import pallas as pl
from jax.experimental.pallas import tpu as pltpu


# ----------------------------- host-side weight construction --------------------

def _cubic(x):
    absx = np.abs(x); absx2 = absx ** 2; absx3 = absx ** 3
    return ((1.5 * absx3 - 2.5 * absx2 + 1.0) * (absx <= 1) +
            (-0.5 * absx3 + 2.5 * absx2 - 4.0 * absx + 2.0) * ((1 < absx) & (absx <= 2)))

def _lanczos2(x): return (np.sinc(x) * np.sinc(x / 2)) * (np.abs(x) < 2)
def _lanczos3(x): return (np.sinc(x) * np.sinc(x / 3)) * (np.abs(x) < 3)
def _box(x):      return ((-0.5 <= x) & (x < 0.5)) * 1.0
def _linear(x):   return ((x + 1) * ((-1 <= x) & (x < 0)) + (1 - x) * ((0 <= x) & (x <= 1)))

_METHODS = {'cubic': (_cubic, 4.0), 'lanczos2': (_lanczos2, 4.0),
            'lanczos3': (_lanczos3, 6.0), 'box': (_box, 1.0),
            'linear': (_linear, 2.0), None: (_cubic, 4.0)}


def _fix_scale_and_size(input_shape, output_shape, scale_factor):
    if scale_factor is not None:
        if np.isscalar(scale_factor) and len(input_shape) > 1:
            scale_factor = [scale_factor, scale_factor]
        scale_factor = list(scale_factor)
        scale_factor = [1] * (len(input_shape) - len(scale_factor)) + scale_factor
    if output_shape is not None:
        output_shape = list(input_shape[len(output_shape):]) + [int(v) for v in output_shape]
    if scale_factor is None:
        scale_factor = 1.0 * np.array(output_shape) / np.array(input_shape)
    if output_shape is None:
        output_shape = np.ceil(np.array(input_shape, dtype=np.float64)
                               * np.array(scale_factor, dtype=np.float64)).astype(np.int64)
    return list(scale_factor), [int(v) for v in output_shape]


def _contributions(in_length, out_length, scale, kernel, kernel_width, antialiasing):
    """Identical math to Resizer.contributions (numpy, host side)."""
    fixed_kernel = (lambda arg: scale * kernel(scale * arg)) if antialiasing else kernel
    kernel_width = kernel_width * (1.0 / scale) if antialiasing else kernel_width
    out_coordinates = np.arange(1, out_length + 1)
    shifted_out_coordinates = out_coordinates - (out_length - in_length * scale) / 2
    match_coordinates = shifted_out_coordinates / scale + 0.5 * (1 - 1 / scale)
    left_boundary = np.floor(match_coordinates - kernel_width / 2)
    expanded_kernel_width = int(np.ceil(kernel_width)) + 2
    field_of_view = (np.expand_dims(left_boundary, axis=1)
                     + np.arange(expanded_kernel_width) - 1).astype(np.int64)
    weights = fixed_kernel(1.0 * np.expand_dims(match_coordinates, axis=1) - field_of_view - 1)
    sum_weights = np.sum(weights, axis=1)
    sum_weights[sum_weights == 0] = 1.0
    weights = 1.0 * weights / np.expand_dims(sum_weights, axis=1)
    mirror = np.concatenate((np.arange(in_length), np.arange(in_length - 1, -1, -1)))
    field_of_view = mirror[np.mod(field_of_view, mirror.shape[0])]
    non_zero = np.nonzero(np.any(weights, axis=0))[0]
    weights = weights[:, non_zero]
    field_of_view = field_of_view[:, non_zero]
    return weights, field_of_view            # (out_length, taps), (out_length, taps)


def build_resize_plan(in_shape, scale_factor=None, output_shape=None,
                      kernel=None, antialiasing=True):
    """Replicates Resizer.__init__ and densifies each 1-D pass into an (out,in) matrix."""
    scale_factor, output_shape = _fix_scale_and_size(in_shape, output_shape, scale_factor)
    method, kernel_width = _METHODS[kernel]
    antialiasing = bool(antialiasing) and bool(np.any(np.array(scale_factor) < 1))
    sorted_dims = [int(d) for d in np.argsort(np.array(scale_factor))
                   if scale_factor[int(d)] != 1]

    mats, fovs, taps = {}, [], []
    for dim in sorted_dims:
        w, fov = _contributions(in_shape[dim], int(output_shape[dim]), scale_factor[dim],
                                method, kernel_width, antialiasing)
        out_len = w.shape[0]
        # Dense (out_len, in_len) matrix; scatter-ADD since mirrored taps can repeat.
        R = np.zeros((out_len, in_shape[dim]), np.float64)
        rows = np.broadcast_to(np.arange(out_len)[:, None], fov.shape)
        np.add.at(R, (rows, fov), w)
        mats[dim] = R.astype(np.float32)
        taps.append(w.T.astype(np.float32))      # (taps, out_len) -- for the JAX reference
        fovs.append(fov.T.astype(np.int64))      # (taps, out_len)
    return sorted_dims, mats, fovs, taps, output_shape


# ----------------------------- Pallas kernel -------------------------------------

def _resize_block_kernel(rh_ref, rwt_ref, x_ref, o_ref):
    """Resample a block of P (batch*channel) planes with MXU matmuls.

    rh_ref : (H_out, H)   column-pass matrix            (VMEM, grid-resident)
    rwt_ref: (W, W_out)   row-pass matrix, transposed   (VMEM, grid-resident)
    x_ref  : (P, H, W)    input planes
    o_ref  : (P, H_out, W_out)
    """
    p, h, w = x_ref.shape
    h_out = rh_ref.shape[0]
    w_out = rwt_ref.shape[1]

    x = x_ref[...].astype(jnp.float32)
    rwt = rwt_ref[...]

    # --- Row pass (contract W) on the MXU. ---
    if h % 8 == 0:
        # (P,H,W) -> (P*H,W) is a free retile when H is sublane-aligned: one tall
        # 2-D matmul, no per-plane weight broadcast, better MXU utilization.
        t = jnp.dot(x.reshape(p * h, w), rwt,
                    preferred_element_type=jnp.float32,
                    precision=lax.Precision.HIGHEST).reshape(p, h, w_out)
    else:
        rwt_b = jnp.broadcast_to(rwt, (p, w, w_out))
        t = jnp.einsum('phw,pwj->phj', x, rwt_b,
                       preferred_element_type=jnp.float32,
                       precision=lax.Precision.HIGHEST)

    # --- Column pass (contract H), batched over planes. ---
    rh_b = jnp.broadcast_to(rh_ref[...], (p, h_out, h))
    out = jnp.einsum('pih,phj->pij', rh_b, t,
                     preferred_element_type=jnp.float32,
                     precision=lax.Precision.HIGHEST)
    o_ref[...] = out.astype(o_ref.dtype)


def _choose_planes_per_block(n_planes, h, w, h_out, w_out, budget_bytes=12 << 20):
    # f32 bytes live per plane per step: input block + row-pass temp + output block
    # + per-plane broadcast of the column-pass weights; x2 for double buffering.
    per_plane = 4 * (h * w + h * w_out + h_out * w_out + h_out * h)
    return int(max(1, min(n_planes, budget_bytes // (2 * per_plane))))


def resizer_forward(x, r_h, r_w):
    """x: (B, C, H, W). r_h: (H_out, H). r_w: (W_out, W). Returns (B, C, H_out, W_out)."""
    b, c, h, w = x.shape
    h_out, w_out = int(r_h.shape[0]), int(r_w.shape[0])
    n = b * c
    xf = x.reshape(n, h, w)

    p = _choose_planes_per_block(n, h, w, h_out, w_out)
    n_pad = (-n) % p
    if n_pad:  # keep the plane block large; pad with zero planes and slice after.
        xf = jnp.concatenate([xf, jnp.zeros((n_pad, h, w), xf.dtype)], axis=0)
    n_total = n + n_pad

    rh = jnp.asarray(r_h, dtype=jnp.float32)       # (H_out, H)
    rwt = jnp.asarray(r_w, dtype=jnp.float32).T    # (W, W_out): row pass is a plain matmul

    out = pl.pallas_call(
        _resize_block_kernel,
        out_shape=jax.ShapeDtypeStruct((n_total, h_out, w_out), x.dtype),
        grid=(n_total // p,),
        in_specs=[
            # Small weight matrices: full blocks, resident in VMEM for the whole grid.
            pl.BlockSpec((h_out, h), lambda g: (0, 0)),
            pl.BlockSpec((w, w_out), lambda g: (0, 0)),
            # P planes per grid step (amortizes per-step overhead, widens stores).
            pl.BlockSpec((p, h, w), lambda g: (g, 0, 0)),
        ],
        out_specs=pl.BlockSpec((p, h_out, w_out), lambda g: (g, 0, 0)),
        compiler_params=pltpu.CompilerParams(
            dimension_semantics=("parallel",),      # shards plane blocks across TCs on v7x
            vmem_limit_bytes=32 * 1024 * 1024,
        ),
    )(rh, rwt, xf)
    if n_pad:
        out = out[:n]
    return out.reshape(b, c, h_out, w_out)


# ----------------------------- pure-JAX reference (torch forward transliterated) --

def resizer_reference(x, sorted_dims, fovs, taps):
    ndim = x.ndim
    for dim, fov, w in zip(sorted_dims, fovs, taps):
        xt = jnp.swapaxes(x, 0, dim)
        gathered = xt[jnp.asarray(fov)]                            # (taps, out, *rest)
        wb = jnp.asarray(w).reshape(w.shape + (1,) * (ndim - 1))
        xt = jnp.sum(gathered * wb, axis=0)
        x = jnp.swapaxes(xt, 0, dim)
    return x


if __name__ == "__main__":
    B, C, H, W = 2, 4, 16, 16
    key = jax.random.PRNGKey(0)
    x = jax.random.normal(key, (B, C, H, W), dtype=jnp.float32)

    in_shape = (B, C, H, W)
    sorted_dims, mats, fovs, taps, out_shape = build_resize_plan(
        in_shape, scale_factor=0.5, kernel=None, antialiasing=True)

    # Pallas kernel handles spatial (H, W) resampling of an NCHW tensor.
    # TODO(synk): resizing along batch/channel dims (possible with Resizer's generic
    # sorted_dims machinery) is not mapped to the Pallas kernel; only dims 2 and 3 are.
    assert all(d in (2, 3) for d in sorted_dims)
    r_h = mats.get(2, np.eye(H, dtype=np.float32))
    r_w = mats.get(3, np.eye(W, dtype=np.float32))

    out = jax.block_until_ready(resizer_forward(x, r_h, r_w))
    assert out.shape == (B, C, out_shape[2], out_shape[3])

    ref = jax.block_until_ready(resizer_reference(x, sorted_dims, fovs, taps))
    np.testing.assert_allclose(np.asarray(out), np.asarray(ref), rtol=2e-3, atol=2e-3)

    print("KERNEL_OK")
</pallas_src>

<mosaic_0001>
module attributes {stable_mosaic.version = 11 : i64} {
  func.func @_resize_block_kernel(%arg0: i32, %arg1: memref<8x16xf32, #tpu.memory_space<vmem>>, %arg2: memref<16x8xf32, #tpu.memory_space<vmem>>, %arg3: memref<8x16x16xf32, #tpu.memory_space<vmem>>, %arg4: memref<8x8x8xf32, #tpu.memory_space<vmem>>) attributes {dimension_semantics = [#tpu.dimension_semantics<parallel>], iteration_bounds = array<i64: 1>, scalar_prefetch = 0 : i64, scratch_operands = 0 : i64, tpu.core_type = #tpu.core_type<tc>, window_params = [{pipeline_mode = #tpu.pipeline_mode<synchronous>, transform_indices = @transform_0, window_bounds = array<i64: 8, 16>}, {pipeline_mode = #tpu.pipeline_mode<synchronous>, transform_indices = @transform_1, window_bounds = array<i64: 16, 8>}, {transform_indices = @transform_2, window_bounds = array<i64: 8, 16, 16>}, {transform_indices = @transform_3, window_bounds = array<i64: 8, 8, 8>}]} {
    %c0 = arith.constant 0 : index
    %c0_0 = arith.constant 0 : index
    %c0_1 = arith.constant 0 : index
    %0 = vector.load %arg3[%c0, %c0_0, %c0_1] : memref<8x16x16xf32, #tpu.memory_space<vmem>>, vector<8x16x16xf32>
    %c0_2 = arith.constant 0 : index
    %c0_3 = arith.constant 0 : index
    %1 = vector.load %arg2[%c0_2, %c0_3] : memref<16x8xf32, #tpu.memory_space<vmem>>, vector<16x8xf32>
    %2 = vector.shape_cast %0 : vector<8x16x16xf32> to vector<128x16xf32>
    %cst = arith.constant dense<0.000000e+00> : vector<128x8xf32>
    %3 = tpu.matmul %2, %1, %cst {dimension_numbers = #tpu.dot_dimension_numbers<[1], [0], [0], [1], [0, 0, 1, 1], [], []>, precision = #tpu.contract_precision<fp32>} : vector<128x16xf32>, vector<16x8xf32>, vector<128x8xf32> -> vector<128x8xf32>
    %4 = vector.shape_cast %3 : vector<128x8xf32> to vector<8x16x8xf32>
    %c0_4 = arith.constant 0 : index
    %c0_5 = arith.constant 0 : index
    %5 = vector.load %arg1[%c0_4, %c0_5] : memref<8x16xf32, #tpu.memory_space<vmem>>, vector<8x16xf32>
    %6 = vector.shape_cast %5 : vector<8x16xf32> to vector<1x8x16xf32>
    %7 = vector.broadcast %6 : vector<1x8x16xf32> to vector<8x8x16xf32>
    "tpu.trace_start"() <{level = 10 : i32, message = "pih,phj->pij"}> : () -> ()
    %cst_6 = arith.constant dense<0.000000e+00> : vector<8x8x8xf32>
    %8 = tpu.matmul %7, %4, %cst_6 {dimension_numbers = #tpu.dot_dimension_numbers<[2], [1], [1], [2], [0, 0, 0, 1, 1, 2], [0], [0]>, precision = #tpu.contract_precision<fp32>} : vector<8x8x16xf32>, vector<8x16x8xf32>, vector<8x8x8xf32> -> vector<8x8x8xf32>
    "tpu.trace_stop"() : () -> ()
    %c0_7 = arith.constant 0 : index
    %c0_8 = arith.constant 0 : index
    %c0_9 = arith.constant 0 : index
    %9 = vector.load %arg4[%c0_7, %c0_8, %c0_9] : memref<8x8x8xf32, #tpu.memory_space<vmem>>, vector<8x8x8xf32>
    tpu.vector_store %arg4[%c0_7, %c0_8, %c0_9], %8 {strides = array<i32>} : memref<8x8x8xf32, #tpu.memory_space<vmem>>, vector<8x8x8xf32>,
    return
  }
  func.func @transform_0(%arg0: i32) -> (i32, i32) {
    %c0_i32 = arith.constant 0 : i32
    %c0_i32_0 = arith.constant 0 : i32
    %c0_i32_1 = arith.constant 0 : i32
    return %c0_i32, %c0_i32_0 : i32, i32
  }
  func.func @transform_1(%arg0: i32) -> (i32, i32) {
    %c0_i32 = arith.constant 0 : i32
    %c0_i32_0 = arith.constant 0 : i32
    %c0_i32_1 = arith.constant 0 : i32
    return %c0_i32, %c0_i32_0 : i32, i32
  }
  func.func @transform_2(%arg0: i32) -> (i32, i32, i32) {
    %c0_i32 = arith.constant 0 : i32
    %c0_i32_0 = arith.constant 0 : i32
    %c0_i32_1 = arith.constant 0 : i32
    return %arg0, %c0_i32, %c0_i32_0 : i32, i32, i32
  }
  func.func @transform_3(%arg0: i32) -> (i32, i32, i32) {
    %c0_i32 = arith.constant 0 : i32
    %c0_i32_0 = arith.constant 0 : i32
    %c0_i32_1 = arith.constant 0 : i32
    return %arg0, %c0_i32, %c0_i32_0 : i32, i32, i32
  }
}

</mosaic_0001>

<bundles_post_ra>
// kernel: tpu_custom_call.1
= control target key start
LH: loop header
LB: loop body
LE: loop exit
PB: predicated region body
PF: predicated region fallthrough
CT: control target
= control target key end

     0   :  { %8 = vsyncpa [#allocation3], 0  ;;  %s2503_s0 = inlined_call_operand.vmem [shape: f32[8,16], index: 0, kind: input, shape index: {}]   ;;  %s2504_s1 = inlined_call_operand.vmem [shape: f32[16,8], index: 1, kind: input, shape index: {}]   ;;  %s2505_s2 = inlined_call_operand.hbm [shape: f32[8,16,16], index: 2, kind: input, shape index: {}]   ;;  %s2506_s3 = inlined_call_operand.hbm [shape: f32[8,8,8], index: 3, kind: output, shape index: {}]  }
   0x1   :  { %9 = vsyncpa [#allocation4], 0  ;;  %s18_s14 = sshll.u32 %s2505_s2, 4  ;;  %s2082_s15 = smov [#allocation2]   ;;  %s19_s14 = int_to_ptr.hbm [resolvable:$true] %s18_s14 }
   0x2   :  { %s20_s16 = sshll.u32 %s2082_s15, 4  ;;  %s2083_s17 = smov 128   ;;  %s21_s16 = int_to_ptr.vmem [resolvable:$true] %s20_s16 }
   0x3   :  { %s2084_s18 = smov 8  }
   0x4   :  { %26 = dma.hbm_to_vmem [thread:$0]  %s19_s14, 2048, %s21_s16, [#allocation3], %s2083_s17, %s2083_s17, %s2084_s18  }
   0x5   :  { %2078 = dma.done.wait [#allocation3], 2048  }
   0x6   :  { %2079 = vsyncadd [#allocation3], 4294965248  ;;  %vm49_vm0 = vcmask 130048   ;;  %v48_v0 = vld [vmem:[%s2504_s1 + $0x8] sm:$0xff]  ;;  %v47_v1 = vld [vmem:[%s2504_s1] sm:$0xff]  ;;  %vm1998_vm1 = vcmask 64512  }
   0x7   :  { %v31_v2 = vld [vmem:[#allocation2] sm:$0xff]  ;;  %v112_v3 = vand.u32 4294901760, %v48_v0  ;;  %v114_v4 = vand.u32 4294901760, %v47_v1  ;;  %v32_v6 = vld [vmem:[#allocation2 + $0x8] sm:$0xff]  ;;  %v33_v9 = vld [vmem:[#allocation2 + $0x10] sm:$0xff]  ;;  %s2013_s26 = sshll.u32 %s2506_s3, 4  ;;  %s2014_s26 = int_to_ptr.hbm [resolvable:$true] %s2013_s26 }
   0x8   :  { %v51_v5 = vsel %vm49_vm0, %v31_v2, 0  ;;  %v54_v8 = vsel %vm49_vm0, %v32_v6, 0  ;;  %v57_v17 = vsel %vm49_vm0, %v33_v9, 0  ;;  %v34_v27 = vld [vmem:[#allocation2 + $0x18] sm:$0xff]  ;;  %v35_v34 = vld [vmem:[#allocation2 + $0x20] sm:$0xff]  ;;  %v36_v41 = vld [vmem:[#allocation2 + $0x28] sm:$0xff] }
   0x9   :  { %v2119_v7 = vand.u32 4294901760, %v51_v5  ;;  %v260_v10 = vsub.f32 %v48_v0, %v112_v3  ;;  %113 = vmatpush.msra.mxu0 %v112_v3  ;;  %v266_v11 = vsub.f32 %v47_v1, %v114_v4  ;;  %452 = vmatpush.msra.mxu3 %v112_v3  ;;  %v2122_v12 = vand.u32 4294901760, %v54_v8  ;;  %v37_v48 = vld [vmem:[#allocation2 + $0x30] sm:$0xff]  ;;  %v38_v55 = vld [vmem:[#allocation2 + $0x38] sm:$0xff]  ;;  %v39_v62 = vld [vmem:[#allocation2 + $0x40] sm:$0xff] }
   0xa   :  { %v2127_v23 = vand.u32 4294901760, %v57_v17  ;;  %v60_v30 = vsel %vm49_vm0, %v34_v27, 0  ;;  %v63_v37 = vsel %vm49_vm0, %v35_v34, 0  ;;  %v66_v44 = vsel %vm49_vm0, %v36_v41, 0 }
   0xb   :  { %v117_v13 = vsub.f32 %v51_v5, %v2119_v7  ;;  %352 = vmatpush.msra.mxu2 %v260_v10  ;;  %115 = vmatpush.msra.mxu0 %v114_v4  ;;  %v261_v14 = vand.u32 4294901760, %v260_v10  ;;  %v267_v15 = vand.u32 4294901760, %v266_v11  ;;  %v125_v16 = vsub.f32 %v54_v8, %v2122_v12  ;;  %v40_v5 = vld [vmem:[#allocation2 + $0x48] sm:$0xff] }
   0xc   :  { %454 = vmatpush.msra.mxu3 %v114_v4  ;;  %v133_v29 = vsub.f32 %v57_v17, %v2127_v23  ;;  %v2132_v33 = vand.u32 4294901760, %v60_v30  ;;  %v2137_v40 = vand.u32 4294901760, %v63_v37  ;;  %v2142_v47 = vand.u32 4294901760, %v66_v44 }
   0xd   :  { %v118_v18 = vand.u32 4294901760, %v117_v13  ;;  %355 = vmatpush.msra.mxu2 %v266_v11  ;;  %v262_v19 = vsub.f32 %v260_v10, %v261_v14  ;;  %v268_v20 = vsub.f32 %v266_v11, %v267_v15  ;;  %569 = vmatpush.msrb.mxu0 %v261_v14  ;;  %v126_v22 = vand.u32 4294901760, %v125_v16  ;;  %v41_v14 = vld [vmem:[#allocation2 + $0x50] sm:$0xff] }
   0xe   :  { %358 = vmatmul.f32.vlgmr.msra.gmra.mxu2 %v117_v13  ;;  %v134_v32 = vand.u32 4294901760, %v133_v29  ;;  %v141_v36 = vsub.f32 %v60_v30, %v2132_v33  ;;  %v149_v43 = vsub.f32 %v63_v37, %v2137_v40  ;;  %v157_v50 = vsub.f32 %v66_v44, %v2142_v47  ;;  %v44_v37 = vld [vmem:[#allocation2 + $0x68] sm:$0xff] }
   0xf   :  { %v119_v21 = vsub.f32 %v117_v13, %v118_v18  ;;  %458 = vmatmul.f32.vlgmr.msra.gmra.mxu3 %v118_v18  ;;  %v263_v24 = vand.u32 4294901760, %v262_v19  ;;  %v269_v25 = vand.u32 4294901760, %v268_v20  ;;  %573 = vmatpush.msrb.mxu0 %v267_v15  ;;  %v127_v28 = vsub.f32 %v125_v16, %v126_v22 }
  0x10   :  { %v135_v35 = vsub.f32 %v133_v29, %v134_v32  ;;  %v142_v39 = vand.u32 4294901760, %v141_v36  ;;  %v150_v46 = vand.u32 4294901760, %v149_v43  ;;  %v69_v51 = vsel %vm49_vm0, %v37_v48, 0 }
  0x11   :  { %v120_v26 = vand.u32 4294901760, %v119_v21  ;;  %264 = vmatpush.msra.mxu1 %v263_v24  ;;  %v128_v31 = vand.u32 4294901760, %v127_v28  ;;  %v158_v53 = vand.u32 4294901760, %v157_v50  ;;  %v2147_v54 = vand.u32 4294901760, %v69_v51  ;;  %v42_v21 = vld [vmem:[#allocation2 + $0x58] sm:$0xff] }
  0x12   :  { %v136_v38 = vand.u32 4294901760, %v135_v35  ;;  %v143_v42 = vsub.f32 %v141_v36, %v142_v39  ;;  %v151_v49 = vsub.f32 %v149_v43, %v150_v46  ;;  %v72_v58 = vsel %vm49_vm0, %v38_v55, 0 }
  0x13   :  { %121 = vmatmul.f32.vlgmr.msra.gmra.mxu0 %v120_v26  ;;  %270 = vmatpush.msra.mxu1 %v269_v25  ;;  %v159_v56 = vsub.f32 %v157_v50, %v158_v53  ;;  %v165_v57 = vsub.f32 %v69_v51, %v2147_v54  ;;  %v2152_v61 = vand.u32 4294901760, %v72_v58  ;;  %v75_v1 = vsel %vm49_vm0, %v39_v62, 0 }
  0x14   :  { %272 = vmatmul.f32.vlgmr.msra.gmra.mxu1 %v2119_v7  ;;  %v144_v45 = vand.u32 4294901760, %v143_v42  ;;  %v152_v52 = vand.u32 4294901760, %v151_v49  ;;  %v78_v9 = vsel %vm49_vm0, %v40_v5, 0  ;;  %v81_v17 = vsel %vm49_vm0, %v41_v14, 0 }
  0x15   :  { %654 = vmatpush.msrb.mxu1 %v112_v3  ;;  %v160_v59 = vand.u32 4294901760, %v159_v56  ;;  %v166_v60 = vand.u32 4294901760, %v165_v57  ;;  %v173_v0 = vsub.f32 %v72_v58, %v2152_v61  ;;  %v2162_v13 = vand.u32 4294901760, %v78_v9 }
  0x16   :  { %363 = vmatmul.f32.gmra.mxu2 %v125_v16  ;;  %v2167_v20 = vand.u32 4294901760, %v81_v17  ;;  %v84_v25 = vsel %vm49_vm0, %v42_v21, 0  ;;  %v90_v41 = vsel %vm49_vm0, %v44_v37, 0 }
  0x17   :  { %464 = vmatmul.f32.gmra.mxu3 %v126_v22  ;;  %656 = vmatpush.msrb.mxu1 %v114_v4  ;;  %v167_v63 = vsub.f32 %v165_v57, %v166_v60  ;;  %v174_v3 = vand.u32 4294901760, %v173_v0  ;;  %v2157_v4 = vand.u32 4294901760, %v75_v1  ;;  %v189_v16 = vsub.f32 %v78_v9, %v2162_v13 }
  0x18   :  { %v197_v24 = vsub.f32 %v81_v17, %v2167_v20  ;;  %v2172_v28 = vand.u32 4294901760, %v84_v25  ;;  %v2182_v44 = vand.u32 4294901760, %v90_v41 }
  0x19   :  { %v168_v2 = vand.u32 4294901760, %v167_v63  ;;  %v175_v6 = vsub.f32 %v173_v0, %v174_v3  ;;  %v181_v8 = vsub.f32 %v75_v1, %v2157_v4  ;;  %v190_v19 = vand.u32 4294901760, %v189_v16 }
  0x1a   :  { %v198_v27 = vand.u32 4294901760, %v197_v24  ;;  %v221_v48 = vsub.f32 %v90_v41, %v2182_v44 }
  0x1b   :  { %129 = vmatmul.f32.gmra.mxu0 %v128_v31  ;;  %v176_v10 = vand.u32 4294901760, %v175_v6  ;;  %v182_v11 = vand.u32 4294901760, %v181_v8  ;;  %v191_v22 = vsub.f32 %v189_v16, %v190_v19  ;;  %v205_v31 = vsub.f32 %v84_v25, %v2172_v28 }
  0x1c   :  { %276 = vmatmul.f32.gmra.mxu1 %v2122_v12  ;;  %v199_v30 = vsub.f32 %v197_v24, %v198_v27  ;;  %v222_v51 = vand.u32 4294901760, %v221_v48 }
  0x1d   :  { %v183_v15 = vsub.f32 %v181_v8, %v182_v11  ;;  %v192_v26 = vand.u32 4294901760, %v191_v22  ;;  %v206_v35 = vand.u32 4294901760, %v205_v31 }
  0x1e   :  { %368 = vmatmul.f32.gmra.mxu2 %v133_v29  ;;  %v43_v29 = vld [vmem:[#allocation2 + $0x60] sm:$0xff]  ;;  %v200_v34 = vand.u32 4294901760, %v199_v30  ;;  %v223_v55 = vsub.f32 %v221_v48, %v222_v51 }
  0x1f   :  { %470 = vmatmul.f32.gmra.mxu3 %v134_v32  ;;  %v184_v18 = vand.u32 4294901760, %v183_v15  ;;  %v87_v32 = vsel %vm49_vm0, %v43_v29, 0 }
  0x20   :  { %v224_v58 = vand.u32 4294901760, %v223_v55 }
  0x23   :  { %137 = vmatmul.f32.gmra.mxu0 %v136_v38  ;;  %v207_v38 = vsub.f32 %v205_v31, %v206_v35 }
  0x24   :  { %280 = vmatmul.f32.gmra.mxu1 %v2127_v23 }
  0x25   :  { %v208_v42 = vand.u32 4294901760, %v207_v38 }
  0x26   :  { %373 = vmatmul.f32.gmra.mxu2 %v141_v36  ;;  %v2177_v36 = vand.u32 4294901760, %v87_v32 }
  0x27   :  { %476 = vmatmul.f32.gmra.mxu3 %v142_v39 }
  0x28   :  { %v213_v39 = vsub.f32 %v87_v32, %v2177_v36 }
  0x2b   :  { %145 = vmatmul.f32.gmra.mxu0 %v144_v45  ;;  %v45_v45 = vld [vmem:[#allocation2 + $0x70] sm:$0xff] }
  0x2c   :  { %284 = vmatmul.f32.gmra.mxu1 %v2132_v33  ;;  %v93_v49 = vsel %vm49_vm0, %v45_v45, 0 }
  0x2e   :  { %378 = vmatmul.f32.gmra.mxu2 %v149_v43  ;;  %v214_v43 = vand.u32 4294901760, %v213_v39 }
  0x2f   :  { %482 = vmatmul.f32.gmra.mxu3 %v150_v46 }
  0x30   :  { %v215_v46 = vsub.f32 %v213_v39, %v214_v43 }
  0x33   :  { %153 = vmatmul.f32.gmra.mxu0 %v152_v52  ;;  %v2187_v52 = vand.u32 4294901760, %v93_v49 }
  0x34   :  { %288 = vmatmul.f32.gmra.mxu1 %v2137_v40 }
  0x35   :  { %v229_v56 = vsub.f32 %v93_v49, %v2187_v52 }
  0x36   :  { %383 = vmatmul.f32.gmra.mxu2 %v157_v50  ;;  %v216_v50 = vand.u32 4294901760, %v215_v46 }
  0x37   :  { %488 = vmatmul.f32.gmra.mxu3 %v158_v53  ;;  %v46_v53 = vld [vmem:[#allocation2 + $0x78] sm:$0xff] }
  0x3b   :  { %161 = vmatmul.f32.gmra.mxu0 %v160_v59  ;;  %v230_v59 = vand.u32 4294901760, %v229_v56 }
  0x3c   :  { %292 = vmatmul.f32.gmra.mxu1 %v2142_v47 }
  0x3d   :  { %v231_v62 = vsub.f32 %v229_v56, %v230_v59 }
  0x3e   :  { %388 = vmatmul.f32.gmra.mxu2 %v165_v57  ;;  %v96_v57 = vsel %vm49_vm0, %v46_v53, 0 }
  0x3f   :  { %494 = vmatmul.f32.gmra.mxu3 %v166_v60  ;;  %v2192_v60 = vand.u32 4294901760, %v96_v57 }
  0x41   :  { %v237_v63 = vsub.f32 %v96_v57, %v2192_v60 }
  0x43   :  { %169 = vmatmul.f32.gmra.mxu0 %v168_v2  ;;  %v238_v1 = vand.u32 4294901760, %v237_v63 }
  0x44   :  { %296 = vmatmul.f32.gmra.mxu1 %v2147_v54 }
  0x45   :  { %v239_v2 = vsub.f32 %v237_v63, %v238_v1 }
  0x46   :  { %393 = vmatmul.f32.gmra.mxu2 %v173_v0  ;;  %v232_v0 = vand.u32 4294901760, %v231_v62 }
  0x47   :  { %500 = vmatmul.f32.gmra.mxu3 %v174_v3  ;;  %v240_v3 = vand.u32 4294901760, %v239_v2 }
  0x4b   :  { %177 = vmatmul.f32.gmra.mxu0 %v176_v10 }
  0x4c   :  { %300 = vmatmul.f32.gmra.mxu1 %v2152_v61 }
  0x4e   :  { %398 = vmatmul.f32.gmra.mxu2 %v181_v8 }
  0x4f   :  { %506 = vmatmul.f32.gmra.mxu3 %v182_v11 }
  0x53   :  { %185 = vmatmul.f32.gmra.mxu0 %v184_v18 }
  0x54   :  { %304 = vmatmul.f32.gmra.mxu1 %v2157_v4 }
  0x56   :  { %403 = vmatmul.f32.gmra.mxu2 %v189_v16 }
  0x57   :  { %512 = vmatmul.f32.gmra.mxu3 %v190_v19 }
  0x5b   :  { %193 = vmatmul.f32.gmra.mxu0 %v192_v26 }
  0x5c   :  { %308 = vmatmul.f32.gmra.mxu1 %v2162_v13 }
  0x5e   :  { %408 = vmatmul.f32.gmra.mxu2 %v197_v24 }
  0x5f   :  { %518 = vmatmul.f32.gmra.mxu3 %v198_v27 }
  0x63   :  { %201 = vmatmul.f32.gmra.mxu0 %v200_v34 }
  0x64   :  { %312 = vmatmul.f32.gmra.mxu1 %v2167_v20 }
  0x66   :  { %413 = vmatmul.f32.gmra.mxu2 %v205_v31 }
  0x67   :  { %524 = vmatmul.f32.gmra.mxu3 %v206_v35 }
  0x6b   :  { %209 = vmatmul.f32.gmra.mxu0 %v208_v42 }
  0x6c   :  { %316 = vmatmul.f32.gmra.mxu1 %v2172_v28 }
  0x6e   :  { %418 = vmatmul.f32.gmra.mxu2 %v213_v39 }
  0x6f   :  { %530 = vmatmul.f32.gmra.mxu3 %v214_v43  ;;  %v722_v43 = vld [vmem:[%s2503_s0] sm:$0xff]  ;;  %s2085_s0 = smov [#allocation5]  }
  0x70   :  { %s2011_s23 = sshll.u32 %s2085_s0, 4  ;;  %s2012_s23 = int_to_ptr.vmem [resolvable:$true] %s2011_s23 }
  0x73   :  { %217 = vmatmul.f32.gmra.mxu0 %v216_v50 }
  0x74   :  { %320 = vmatmul.f32.gmra.mxu1 %v2177_v36 }
  0x76   :  { %423 = vmatmul.f32.gmra.mxu2 %v221_v48  ;;  %v724_v48 = vsel %vm49_vm0, %v722_v43, 0 }
  0x77   :  { %536 = vmatmul.f32.gmra.mxu3 %v222_v51  ;;  %v2292_v50 = vand.u32 4294901760, %v724_v48 }
  0x7b   :  { %225 = vmatmul.f32.gmra.mxu0 %v224_v58  ;;  %v2297_v58 = vsub.f32 %v724_v48, %v2292_v50 }
  0x7c   :  { %324 = vmatmul.f32.gmra.mxu1 %v2182_v44 }
  0x7e   :  { %428 = vmatmul.f32.gmra.mxu2 %v229_v56 }
  0x7f   :  { %542 = vmatmul.f32.gmra.mxu3 %v230_v59 }
  0x83   :  { %233 = vmatmul.f32.gmra.mxu0 %v232_v0  ;;  %v2302_v0 = vand.u32 4294901760, %v2297_v58 }
  0x84   :  { %328 = vmatmul.f32.gmra.mxu1 %v2187_v52 }
  0x86   :  { %433 = vmatmul.f32.gmra.mxu2 %v237_v63 }
  0x87   :  { %548 = vmatmul.f32.gmra.mxu3 %v238_v1 }
  0x8b   :  { %241 = vmatmul.f32.gmra.mxu0 %v240_v3 }
  0x8c   :  { %332 = vmatmul.f32.gmra.mxu1 %v2192_v60 }
  0x90   :  { %v2198_v5 = vpop.f32.mrf.mxu0 }
  0x91   :  { %v2200_v6 = vpop.f32.mrf.mxu1  ;;  %v359_v25 = vpop.f32.mrf.mxu2 }
  0x92   :  { %v459_v26 = vpop.f32.mrf.mxu3 }
  0x93   :  { %575 = vmatmul.f32.vlgmr.msrb.gmra.mxu0 %v2119_v7 }
  0x94   :  { %658 = vmatmul.f32.vlgmr.msrb.gmra.mxu1 %v2119_v7 }
  0x98   :  { %v2204_v8 = vpop.f32.mrf.mxu0 }
  0x99   :  { %v2206_v9 = vpop.f32.mrf.mxu1  ;;  %v364_v30 = vpop.f32.mrf.mxu2 }
  0x9b   :  { %579 = vmatmul.f32.gmra.mxu0 %v2122_v12 }
  0x9c   :  { %662 = vmatmul.f32.gmra.mxu1 %v2122_v12 }
  0xa0   :  { %v2210_v10 = vpop.f32.mrf.mxu0 }
  0xa1   :  { %v2212_v11 = vpop.f32.mrf.mxu1 }
  0xa2   :  { %v282_v1 = vadd.f32 %v2212_v11, %v2210_v10 }
  0xa3   :  { %583 = vmatmul.f32.gmra.mxu0 %v2127_v23 }
  0xa4   :  { %666 = vmatmul.f32.gmra.mxu1 %v2127_v23 }
  0xa8   :  { %v2216_v14 = vpop.f32.mrf.mxu0 }
  0xa9   :  { %v2218_v15 = vpop.f32.mrf.mxu1 }
  0xab   :  { %587 = vmatmul.f32.gmra.mxu0 %v2132_v33 }
  0xac   :  { %670 = vmatmul.f32.gmra.mxu1 %v2132_v33 }
  0xb0   :  { %v2222_v7 = vpop.f32.mrf.mxu0 }
  0xb1   :  { %v2224_v16 = vpop.f32.mrf.mxu1 }
  0xb3   :  { %591 = vmatmul.f32.gmra.mxu0 %v2137_v40 }
  0xb4   :  { %674 = vmatmul.f32.gmra.mxu1 %v2137_v40 }
  0xb8   :  { %v2228_v12 = vpop.f32.mrf.mxu0 }
  0xb9   :  { %v2230_v17 = vpop.f32.mrf.mxu1 }
  0xbb   :  { %595 = vmatmul.f32.gmra.mxu0 %v2142_v47 }
  0xbc   :  { %678 = vmatmul.f32.gmra.mxu1 %v2142_v47 }
  0xc0   :  { %v2234_v23 = vpop.f32.mrf.mxu0 }
  0xc1   :  { %v2236_v18 = vpop.f32.mrf.mxu1 }
  0xc3   :  { %599 = vmatmul.f32.gmra.mxu0 %v2147_v54 }
  0xc4   :  { %682 = vmatmul.f32.gmra.mxu1 %v2147_v54 }
  0xc8   :  { %v2240_v33 = vpop.f32.mrf.mxu0 }
  0xc9   :  { %v2242_v19 = vpop.f32.mrf.mxu1 }
  0xcb   :  { %603 = vmatmul.f32.gmra.mxu0 %v2152_v61 }
  0xcc   :  { %686 = vmatmul.f32.gmra.mxu1 %v2152_v61 }
  0xd0   :  { %v2246_v40 = vpop.f32.mrf.mxu0 }
  0xd1   :  { %v2248_v21 = vpop.f32.mrf.mxu1 }
  0xd3   :  { %607 = vmatmul.f32.gmra.mxu0 %v2157_v4 }
  0xd4   :  { %690 = vmatmul.f32.gmra.mxu1 %v2157_v4 }
  0xd8   :  { %v2252_v47 = vpop.f32.mrf.mxu0 }
  0xd9   :  { %v2254_v22 = vpop.f32.mrf.mxu1 }
  0xdb   :  { %611 = vmatmul.f32.gmra.mxu0 %v2162_v13 }
  0xdc   :  { %694 = vmatmul.f32.gmra.mxu1 %v2162_v13 }
  0xe0   :  { %v2258_v54 = vpop.f32.mrf.mxu0 }
  0xe1   :  { %v2260_v24 = vpop.f32.mrf.mxu1 }
  0xe3   :  { %615 = vmatmul.f32.gmra.mxu0 %v2167_v20 }
  0xe4   :  { %698 = vmatmul.f32.gmra.mxu1 %v2167_v20  ;;  %v465_v20 = vpop.f32.mrf.mxu3 }
  0xe8   :  { %v2264_v61 = vpop.f32.mrf.mxu0 }
  0xe9   :  { %v2266_v4 = vpop.f32.mrf.mxu1 }
  0xeb   :  { %619 = vmatmul.f32.gmra.mxu0 %v2172_v28 }
  0xec   :  { %702 = vmatmul.f32.gmra.mxu1 %v2172_v28  ;;  %v369_v28 = vpop.f32.mrf.mxu2  ;;  %v471_v37 = vpop.f32.mrf.mxu3 }
  0xf0   :  { %v218_v27 = vpop.f32.mrf.mxu0 }
  0xf1   :  { %v321_v13 = vpop.f32.mrf.mxu1 }
  0xf2   :  { %v2270_v29 = vadd.f32 %v321_v13, %v218_v27 }
  0xf3   :  { %623 = vmatmul.f32.gmra.mxu0 %v2177_v36 }
  0xf4   :  { %706 = vmatmul.f32.gmra.mxu1 %v2177_v36  ;;  %v274_v36 = vadd.f32 %v2200_v6, %v2198_v5  ;;  %v374_v41 = vpop.f32.mrf.mxu2  ;;  %v477_v49 = vpop.f32.mrf.mxu3 }
  0xf6   :  { %v360_v45 = vadd.f32 %v359_v25, %v274_v36 }
  0xf8   :  { %v226_v31 = vpop.f32.mrf.mxu0  ;;  %v460_v51 = vadd.f32 %v459_v26, %v360_v45 }
  0xf9   :  { %v325_v32 = vpop.f32.mrf.mxu1 }
  0xfa   :  { %v2274_v34 = vadd.f32 %v325_v32, %v226_v31 }
  0xfb   :  { %627 = vmatmul.f32.gmra.mxu0 %v2182_v44 }
  0xfc   :  { %710 = vmatmul.f32.gmra.mxu1 %v2182_v44  ;;  %v379_v56 = vpop.f32.mrf.mxu2  ;;  %v2299_v63 = vpop.f32.mrf.mxu3 }
 0x100   :  { %v234_v35 = vpop.f32.mrf.mxu0 }
 0x101   :  { %v329_v38 = vpop.f32.mrf.mxu1 }
 0x102   :  { %v2278_v39 = vadd.f32 %v329_v38, %v234_v35 }
 0x103   :  { %631 = vmatmul.f32.gmra.mxu0 %v2187_v52 }
 0x104   :  { %714 = vmatmul.f32.gmra.mxu1 %v2187_v52  ;;  %v278_v52 = vadd.f32 %v2206_v9, %v2204_v8  ;;  %v747_v8 = vsub.f32 %v2297_v58, %v2302_v0  ;;  %v370_v9 = vadd.f32 %v369_v28, %v282_v1  ;;  %v384_v27 = vpop.f32.mrf.mxu2  ;;  %v489_v11 = vpop.f32.mrf.mxu3 }
 0x106   :  { %v365_v59 = vadd.f32 %v364_v30, %v278_v52  ;;  %v2308_v30 = vand.u32 4294901760, %v747_v8  ;;  %v472_v31 = vadd.f32 %v471_v37, %v370_v9 }
 0x108   :  { %v242_v42 = vpop.f32.mrf.mxu0 }
 0x109   :  { %v333_v44 = vpop.f32.mrf.mxu1 }
 0x10a   :  { %v2287_v46 = vadd.f32 %v333_v44, %v242_v42 }
 0x10b   :  { %635 = vmatmul.f32.gmra.mxu0 %v2192_v60 }
 0x10c   :  { %718 = vmatmul.f32.gmra.mxu1 %v2192_v60  ;;  %v466_v60 = vadd.f32 %v465_v20, %v365_v59  ;;  %v286_v20 = vadd.f32 %v2218_v15, %v2216_v14  ;;  %v2313_v48 = vpop.f32.mrf.mxu2 }
 0x10e   :  { %v375_v28 = vadd.f32 %v374_v41, %v286_v20 }
 0x110   :  { %v576_v53 = vpop.f32.mrf.mxu0  ;;  %v478_v14 = vadd.f32 %v477_v49, %v375_v28 }
 0x111   :  { %v577_v55 = vadd.f32 %v576_v53, %v460_v51  ;;  %v659_v57 = vpop.f32.mrf.mxu1  ;;  %v290_v53 = vadd.f32 %v2224_v16, %v2222_v7  ;;  %v294_v7 = vadd.f32 %v2230_v17, %v2228_v12 }
 0x113   :  { %v660_v62 = vadd.f32 %v659_v57, %v577_v55  ;;  %v2319_v55 = vpop.f32.mrf.mxu3 }
 0x115   :  { %v742_v2 = vand.u32 4294901760, %v660_v62 }
 0x117   :  { %v774_v25 = vsub.f32 %v660_v62, %v742_v2  ;;  %v380_v62 = vadd.f32 %v379_v56, %v290_v53  ;;  %v385_v56 = vadd.f32 %v384_v27, %v294_v7 }
 0x118   :  { %v580_v3 = vpop.f32.mrf.mxu0 }
 0x119   :  { %v581_v5 = vadd.f32 %v580_v3, %v466_v60  ;;  %v663_v6 = vpop.f32.mrf.mxu1  ;;  %v775_v10 = vand.u32 4294901760, %v774_v25  ;;  %v394_v3 = vpop.f32.mrf.mxu2 }
 0x11b   :  { %v664_v26 = vadd.f32 %v663_v6, %v581_v5  ;;  %v776_v45 = vsub.f32 %v774_v25, %v775_v10  ;;  %v484_v6 = vadd.f32 %v2299_v63, %v380_v62  ;;  %v501_v17 = vpop.f32.mrf.mxu3 }
 0x11d   :  { %v740_v13 = vand.u32 4294901760, %v664_v26  ;;  %v777_v51 = vand.u32 4294901760, %v776_v45  ;;  %v298_v45 = vadd.f32 %v2236_v18, %v2234_v23 }
 0x11f   :  { %v768_v32 = vsub.f32 %v664_v26, %v740_v13  ;;  %741 = vmatpush.msrb.mxu2 %v740_v13 }
 0x120   :  { %v584_v35 = vpop.f32.mrf.mxu0 }
 0x121   :  { %v769_v38 = vand.u32 4294901760, %v768_v32  ;;  %v585_v36 = vadd.f32 %v584_v35, %v472_v31  ;;  %743 = vmatpush.msrb.mxu2 %v742_v2  ;;  %v667_v42 = vpop.f32.mrf.mxu1 }
 0x122   :  { %749 = vmatmul.f32.vlgmr.msrb.gmra.mxu2 %v2308_v30 }
 0x123   :  { %v668_v43 = vadd.f32 %v667_v42, %v585_v36  ;;  %800 = vmatpush.msra.mxu2 %v768_v32  ;;  %v770_v44 = vsub.f32 %v768_v32, %v769_v38  ;;  %v302_v42 = vadd.f32 %v2242_v19, %v2240_v33  ;;  %v390_v19 = vadd.f32 %v2313_v48, %v298_v45 }
 0x125   :  { %803 = vmatpush.msra.mxu2 %v774_v25  ;;  %v771_v37 = vand.u32 4294901760, %v770_v44  ;;  %v2315_v15 = vand.u32 4294901760, %v668_v43 }
 0x127   :  { %852 = vmatpush.msrb.mxu2 %v769_v38  ;;  %772 = vmatpush.msrb.mxu3 %v771_v37  ;;  %v933_v49 = vsub.f32 %v668_v43, %v2315_v15 }
 0x128   :  { %v588_v52 = vpop.f32.mrf.mxu0 }
 0x129   :  { %856 = vmatpush.msrb.mxu2 %v775_v10  ;;  %v589_v41 = vadd.f32 %v588_v52, %v478_v14  ;;  %778 = vmatpush.msrb.mxu3 %v777_v51  ;;  %v671_v57 = vpop.f32.mrf.mxu1  ;;  %v934_v1 = vand.u32 4294901760, %v933_v49  ;;  %v2330_v10 = vpop.f32.mrf.mxu2  ;;  %v395_v51 = vadd.f32 %v394_v3, %v302_v42 }
 0x12a   :  { %780 = vmatmul.f32.vlgmr.msrb.gmra.mxu3 %v2292_v50  ;;  %806 = vmatmul.f32.vlgmr.msra.gmra.mxu2 %v2297_v58 }
 0x12b   :  { %v672_v59 = vadd.f32 %v671_v57, %v589_v41  ;;  %825 = vmatpush.msra.mxu3 %v740_v13  ;;  %v935_v12 = vsub.f32 %v933_v49, %v934_v1  ;;  %v502_v23 = vadd.f32 %v501_v17, %v395_v51  ;;  %v306_v17 = vadd.f32 %v2248_v21, %v2246_v40 }
 0x12c   :  { %v318_v21 = vadd.f32 %v2266_v4, %v2264_v61 }
 0x12d   :  { %v899_v60 = vand.u32 4294901760, %v672_v59  ;;  %827 = vmatpush.msra.mxu3 %v742_v2  ;;  %v936_v63 = vand.u32 4294901760, %v935_v12 }
 0x12f   :  { %877 = vmatpush.msrb.mxu3 %v740_v13  ;;  %v927_v16 = vsub.f32 %v672_v59, %v899_v60  ;;  %900 = vmatpush.msra.mxu2 %v899_v60 }
 0x130   :  { %v592_v5 = vpop.f32.mrf.mxu0 }
 0x131   :  { %879 = vmatpush.msrb.mxu3 %v742_v2  ;;  %v928_v8 = vand.u32 4294901760, %v927_v16  ;;  %902 = vmatpush.msra.mxu2 %v2315_v15  ;;  %v675_v9 = vpop.f32.mrf.mxu1  ;;  %v593_v26 = vadd.f32 %v592_v5, %v484_v6  ;;  %v490_v2 = vadd.f32 %v489_v11, %v385_v56  ;;  %v2339_v11 = vpop.f32.mrf.mxu3  ;;  %v310_v56 = vadd.f32 %v2254_v22, %v2252_v47 }
 0x132   :  { %831 = vmatmul.f32.vlgmr.msra.gmra.mxu3 %v2302_v0  ;;  %858 = vmatmul.f32.vlgmr.msrb.gmra.mxu2 %v2292_v50  ;;  %v404_v33 = vpop.f32.mrf.mxu2  ;;  %v314_v47 = vadd.f32 %v2260_v24, %v2258_v54 }
 0x133   :  { %v929_v25 = vsub.f32 %v927_v16, %v928_v8  ;;  %959 = vmatpush.msrb.mxu2 %v927_v16  ;;  %v676_v31 = vadd.f32 %v675_v9, %v593_v26 }
 0x135   :  { %962 = vmatpush.msrb.mxu2 %v933_v49  ;;  %v930_v13 = vand.u32 4294901760, %v929_v25  ;;  %v2334_v27 = vand.u32 4294901760, %v676_v31  ;;  %v496_v49 = vadd.f32 %v2319_v55, %v390_v19 }
 0x137   :  { %931 = vmatpush.msra.mxu3 %v930_v13  ;;  %v1092_v28 = vsub.f32 %v676_v31, %v2334_v27  ;;  %v405_v31 = vadd.f32 %v404_v33, %v310_v56 }
 0x138   :  { %v596_v20 = vpop.f32.mrf.mxu0 }
 0x139   :  { %v597_v32 = vadd.f32 %v596_v20, %v490_v2  ;;  %937 = vmatpush.msra.mxu3 %v936_v63  ;;  %v679_v35 = vpop.f32.mrf.mxu1  ;;  %v1093_v52 = vand.u32 4294901760, %v1092_v28  ;;  %v513_v41 = vpop.f32.mrf.mxu3  ;;  %v400_v20 = vadd.f32 %v2330_v10, %v306_v17 }
 0x13a   :  { %881 = vmatmul.f32.vlgmr.msrb.gmra.mxu3 %v2292_v50  ;;  %908 = vmatmul.f32.vlgmr.msra.gmra.mxu2 %v2308_v30  ;;  %v409_v16 = vpop.f32.mrf.mxu2  ;;  %v514_v40 = vadd.f32 %v513_v41, %v405_v31 }
 0x13b   :  { %v680_v38 = vadd.f32 %v679_v35, %v597_v32  ;;  %984 = vmatpush.msrb.mxu3 %v899_v60  ;;  %1011 = vmatpush.msra.mxu2 %v928_v8  ;;  %v1094_v18 = vsub.f32 %v1092_v28, %v1093_v52  ;;  %v508_v42 = vadd.f32 %v2339_v11, %v400_v20 }
 0x13d   :  { %v2336_v36 = vand.u32 4294901760, %v680_v38  ;;  %986 = vmatpush.msrb.mxu3 %v2315_v15  ;;  %1015 = vmatpush.msra.mxu2 %v934_v1  ;;  %v1095_v48 = vand.u32 4294901760, %v1094_v18 }
 0x13f   :  { %v1086_v43 = vsub.f32 %v680_v38, %v2336_v36  ;;  %v410_v38 = vadd.f32 %v409_v16, %v314_v47 }
 0x140   :  { %v600_v44 = vpop.f32.mrf.mxu0 }
 0x141   :  { %v1087_v37 = vand.u32 4294901760, %v1086_v43  ;;  %v683_v14 = vpop.f32.mrf.mxu1  ;;  %v601_v7 = vadd.f32 %v600_v44, %v496_v49  ;;  %v519_v55 = vpop.f32.mrf.mxu3 }
 0x142   :  { %939 = vmatmul.f32.vlgmr.msra.gmra.mxu3 %v2292_v50  ;;  %965 = vmatmul.f32.vlgmr.msrb.gmra.mxu2 %v2297_v58  ;;  %v414_v26 = vpop.f32.mrf.mxu2  ;;  %v520_v45 = vadd.f32 %v519_v55, %v410_v38 }
 0x143   :  { %1036 = vmatpush.msra.mxu3 %v899_v60  ;;  %1059 = vmatpush.msrb.mxu2 %v2336_v36  ;;  %v1088_v53 = vsub.f32 %v1086_v43, %v1087_v37  ;;  %v684_v1 = vadd.f32 %v683_v14, %v601_v7  ;;  %v415_v10 = vadd.f32 %v414_v26, %v318_v21 }
 0x145   :  { %1038 = vmatpush.msra.mxu3 %v2315_v15  ;;  %1061 = vmatpush.msrb.mxu2 %v2334_v27  ;;  %v1089_v62 = vand.u32 4294901760, %v1088_v53  ;;  %v2360_v8 = vand.u32 4294901760, %v684_v1 }
 0x147   :  { %v1251_v25 = vsub.f32 %v684_v1, %v2360_v8 }
 0x148   :  { %v604_v57 = vpop.f32.mrf.mxu0 }
 0x149   :  { %v605_v59 = vadd.f32 %v604_v57, %v502_v23  ;;  %v687_v60 = vpop.f32.mrf.mxu1  ;;  %v1252_v63 = vand.u32 4294901760, %v1251_v25  ;;  %v525_v22 = vpop.f32.mrf.mxu3 }
 0x14a   :  { %990 = vmatmul.f32.vlgmr.msrb.gmra.mxu3 %v2302_v0  ;;  %1017 = vmatmul.f32.vlgmr.msra.gmra.mxu2 %v2292_v50  ;;  %v419_v54 = vpop.f32.mrf.mxu2  ;;  %v526_v11 = vadd.f32 %v525_v22, %v415_v10 }
 0x14b   :  { %1090 = vmatpush.msrb.mxu3 %v1089_v62  ;;  %1118 = vmatpush.msra.mxu2 %v1086_v43  ;;  %v688_v15 = vadd.f32 %v687_v60, %v605_v59  ;;  %v1253_v35 = vsub.f32 %v1251_v25, %v1252_v63  ;;  %v420_v23 = vadd.f32 %v419_v54, %v2270_v29 }
 0x14d   :  { %1096 = vmatpush.msrb.mxu3 %v1095_v48  ;;  %1121 = vmatpush.msra.mxu2 %v1092_v28  ;;  %v2356_v5 = vand.u32 4294901760, %v688_v15  ;;  %v1254_v44 = vand.u32 4294901760, %v1253_v35 }
 0x14f   :  { %v1245_v9 = vsub.f32 %v688_v15, %v2356_v5 }
 0x150   :  { %v608_v3 = vpop.f32.mrf.mxu0 }
 0x151   :  { %v691_v6 = vpop.f32.mrf.mxu1  ;;  %v1246_v13 = vand.u32 4294901760, %v1245_v9  ;;  %v531_v4 = vpop.f32.mrf.mxu3 }
 0x152   :  { %1040 = vmatmul.f32.vlgmr.msra.gmra.mxu3 %v2292_v50  ;;  %1067 = vmatmul.f32.vlgmr.msrb.gmra.mxu2 %v2308_v30  ;;  %v424_v57 = vpop.f32.mrf.mxu2  ;;  %v532_v60 = vadd.f32 %v531_v4, %v420_v23 }
 0x153   :  { %1143 = vmatpush.msra.mxu3 %v2336_v36  ;;  %1170 = vmatpush.msrb.mxu2 %v1087_v37  ;;  %v1247_v32 = vsub.f32 %v1245_v9, %v1246_v13 }
 0x155   :  { %1145 = vmatpush.msra.mxu3 %v2334_v27  ;;  %1174 = vmatpush.msrb.mxu2 %v1093_v52  ;;  %v1248_v43 = vand.u32 4294901760, %v1247_v32 }
 0x158   :  { %v612_v12 = vpop.f32.mrf.mxu0 }
 0x159   :  { %v695_v2 = vpop.f32.mrf.mxu1  ;;  %v613_v28 = vadd.f32 %v612_v12, %v514_v40  ;;  %v537_v48 = vpop.f32.mrf.mxu3 }
 0x15a   :  { %1098 = vmatmul.f32.vlgmr.msrb.gmra.mxu3 %v2292_v50  ;;  %1124 = vmatmul.f32.vlgmr.msra.gmra.mxu2 %v2297_v58  ;;  %v429_v26 = vpop.f32.mrf.mxu2 }
 0x15b   :  { %1195 = vmatpush.msrb.mxu3 %v2336_v36  ;;  %1218 = vmatpush.msra.mxu2 %v2356_v5  ;;  %v696_v61 = vadd.f32 %v695_v2, %v613_v28  ;;  %v430_v21 = vadd.f32 %v429_v26, %v2278_v39 }
 0x15d   :  { %1197 = vmatpush.msrb.mxu3 %v2334_v27  ;;  %1220 = vmatpush.msra.mxu2 %v2360_v8  ;;  %v609_v27 = vadd.f32 %v608_v3, %v508_v42  ;;  %v2384_v52 = vand.u32 4294901760, %v696_v61 }
 0x15f   :  { %v692_v14 = vadd.f32 %v691_v6, %v609_v27  ;;  %v2393_v49 = vsub.f32 %v696_v61, %v2384_v52  ;;  %v425_v6 = vadd.f32 %v424_v57, %v2274_v34 }
 0x160   :  { %v616_v36 = vpop.f32.mrf.mxu0 }
 0x161   :  { %v699_v24 = vpop.f32.mrf.mxu1  ;;  %v617_v37 = vadd.f32 %v616_v36, %v520_v45  ;;  %v2389_v18 = vand.u32 4294901760, %v692_v14  ;;  %v1405_v16 = vand.u32 4294901760, %v2393_v49  ;;  %v538_v34 = vadd.f32 %v537_v48, %v425_v6  ;;  %v543_v31 = vpop.f32.mrf.mxu3 }
 0x162   :  { %1149 = vmatmul.f32.vlgmr.msra.gmra.mxu3 %v2302_v0  ;;  %1176 = vmatmul.f32.vlgmr.msrb.gmra.mxu2 %v2292_v50  ;;  %v434_v35 = vpop.f32.mrf.mxu2  ;;  %v544_v54 = vadd.f32 %v543_v31, %v430_v21 }
 0x163   :  { %1249 = vmatpush.msra.mxu3 %v1248_v43  ;;  %1277 = vmatpush.msrb.mxu2 %v1245_v9  ;;  %v700_v19 = vadd.f32 %v699_v24, %v617_v37  ;;  %v2401_v29 = vsub.f32 %v692_v14, %v2389_v18  ;;  %v435_v28 = vadd.f32 %v434_v35, %v2287_v46 }
 0x165   :  { %1255 = vmatpush.msra.mxu3 %v1254_v44  ;;  %1280 = vmatpush.msrb.mxu2 %v1251_v25  ;;  %v2398_v62 = vand.u32 4294901760, %v700_v19  ;;  %v1411_v56 = vand.u32 4294901760, %v2401_v29  ;;  %v1406_v25 = vsub.f32 %v2393_v49, %v1405_v16 }
 0x167   :  { %v2411_v3 = vsub.f32 %v700_v19, %v2398_v62  ;;  %v1407_v2 = vand.u32 4294901760, %v1406_v25 }
 0x168   :  { %v620_v51 = vpop.f32.mrf.mxu0 }
 0x169   :  { %v621_v33 = vadd.f32 %v620_v51, %v526_v11  ;;  %v703_v53 = vpop.f32.mrf.mxu1  ;;  %v549_v24 = vpop.f32.mrf.mxu3  ;;  %v1570_v51 = vand.u32 4294901760, %v2411_v3 }
 0x16a   :  { %1199 = vmatmul.f32.vlgmr.msrb.gmra.mxu3 %v2292_v50  ;;  %1226 = vmatmul.f32.vlgmr.msra.gmra.mxu2 %v2308_v30  ;;  %v550_v44 = vadd.f32 %v549_v24, %v435_v28 }
 0x16b   :  { %v704_v41 = vadd.f32 %v703_v53, %v621_v33  ;;  %1302 = vmatpush.msrb.mxu3 %v2356_v5  ;;  %1329 = vmatpush.msra.mxu2 %v1246_v13 }
 0x16d   :  { %v2395_v59 = vand.u32 4294901760, %v704_v41  ;;  %1304 = vmatpush.msrb.mxu3 %v2360_v8  ;;  %1333 = vmatpush.msra.mxu2 %v1252_v63 }
 0x16f   :  { %v2404_v7 = vsub.f32 %v704_v41, %v2395_v59  ;;  %1620 = vmatpush.msra.mxu1 %v2395_v59 }
 0x170   :  { %v624_v15 = vpop.f32.mrf.mxu0 }
 0x171   :  { %v625_v1 = vadd.f32 %v624_v15, %v532_v60  ;;  %1595 = vmatpush.msra.mxu0 %v2404_v7  ;;  %1622 = vmatpush.msra.mxu1 %v2398_v62  ;;  %v707_v55 = vpop.f32.mrf.mxu1  ;;  %v1564_v61 = vand.u32 4294901760, %v2404_v7 }
 0x172   :  { %1257 = vmatmul.f32.vlgmr.msra.gmra.mxu3 %v2292_v50  ;;  %1283 = vmatmul.f32.vlgmr.msrb.gmra.mxu2 %v2297_v58 }
 0x173   :  { %v708_v9 = vadd.f32 %v707_v55, %v625_v1  ;;  %1354 = vmatpush.msra.mxu3 %v2356_v5  ;;  %1377 = vmatpush.msrb.mxu2 %v2384_v52  ;;  %v1412_v5 = vsub.f32 %v2401_v29, %v1411_v56  ;;  %v1565_v33 = vsub.f32 %v2404_v7, %v1564_v61 }
 0x174   :  { %1598 = vmatpush.msra.mxu0 %v2411_v3  ;;  %1626 = vmatmul.f32.vlgmr.msra.gmra.mxu1 %v2302_v0 }
 0x175   :  { %1356 = vmatpush.msra.mxu3 %v2360_v8  ;;  %1379 = vmatpush.msrb.mxu2 %v2389_v18  ;;  %v2425_v12 = vand.u32 4294901760, %v708_v9  ;;  %v1413_v22 = vand.u32 4294901760, %v1412_v5  ;;  %v1566_v41 = vand.u32 4294901760, %v1565_v33 }
 0x176   :  { %1601 = vmatmul.f32.vlgmr.msra.gmra.mxu0 %v2297_v58 }
 0x177   :  { %v2431_v8 = vsub.f32 %v708_v9, %v2425_v12 }
 0x178   :  { %v628_v17 = vpop.f32.mrf.mxu0 }
 0x179   :  { %v629_v13 = vadd.f32 %v628_v17, %v538_v34  ;;  %v711_v63 = vpop.f32.mrf.mxu1  ;;  %v1729_v40 = vand.u32 4294901760, %v2431_v8 }
 0x17a   :  { %1308 = vmatmul.f32.vlgmr.msrb.gmra.mxu3 %v2302_v0  ;;  %1335 = vmatmul.f32.vlgmr.msra.gmra.mxu2 %v2292_v50 }
 0x17b   :  { %v712_v47 = vadd.f32 %v711_v63, %v629_v13  ;;  %1408 = vmatpush.msrb.mxu3 %v1407_v2  ;;  %1436 = vmatpush.msra.mxu2 %v2393_v49  ;;  %v1730_v39 = vsub.f32 %v2431_v8, %v1729_v40 }
 0x17d   :  { %v2434_v20 = vand.u32 4294901760, %v712_v47  ;;  %1414 = vmatpush.msrb.mxu3 %v1413_v22  ;;  %1439 = vmatpush.msra.mxu2 %v2401_v29  ;;  %v1731_v45 = vand.u32 4294901760, %v1730_v39 }
 0x17f   :  { %v2438_v32 = vsub.f32 %v712_v47, %v2434_v20  ;;  %1695 = vmatpush.msrb.mxu0 %v2434_v20 }
 0x180   :  { %v632_v38 = vpop.f32.mrf.mxu0 }
 0x181   :  { %v1723_v36 = vand.u32 4294901760, %v2438_v32  ;;  %1697 = vmatpush.msrb.mxu0 %v2425_v12  ;;  %v715_v42 = vpop.f32.mrf.mxu1  ;;  %v633_v27 = vadd.f32 %v632_v38, %v544_v54 }
 0x182   :  { %1358 = vmatmul.f32.vlgmr.msra.gmra.mxu3 %v2292_v50  ;;  %1385 = vmatmul.f32.vlgmr.msrb.gmra.mxu2 %v2308_v30 }
 0x183   :  { %v1724_v43 = vsub.f32 %v2438_v32, %v1723_v36  ;;  %1461 = vmatpush.msra.mxu3 %v2384_v52  ;;  %1488 = vmatpush.msrb.mxu2 %v1405_v16  ;;  %v716_v37 = vadd.f32 %v715_v42, %v633_v27 }
 0x184   :  { %1806 = vmatpush.msra.mxu0 %v1723_v36 }
 0x185   :  { %1463 = vmatpush.msra.mxu3 %v2389_v18  ;;  %1492 = vmatpush.msrb.mxu2 %v1411_v56  ;;  %v1725_v10 = vand.u32 4294901760, %v1724_v43  ;;  %v1855_v53 = vand.u32 4294901760, %v716_v37 }
 0x186   :  { %1810 = vmatpush.msra.mxu0 %v1729_v40 }
 0x187   :  { %1726 = vmatpush.msrb.mxu1 %v1725_v10  ;;  %1703 = vmatmul.f32.vlgmr.msrb.gmra.mxu0 %v2308_v30  ;;  %v1887_v57 = vsub.f32 %v716_v37, %v1855_v53 }
 0x188   :  { %v636_v46 = vpop.f32.mrf.mxu0 }
 0x189   :  { %v637_v4 = vadd.f32 %v636_v46, %v550_v44  ;;  %1732 = vmatpush.msrb.mxu1 %v1731_v45  ;;  %v719_v11 = vpop.f32.mrf.mxu1  ;;  %v1888_v60 = vand.u32 4294901760, %v1887_v57 }
 0x18a   :  { %1416 = vmatmul.f32.vlgmr.msrb.gmra.mxu3 %v2292_v50  ;;  %1442 = vmatmul.f32.vlgmr.msra.gmra.mxu2 %v2297_v58 }
 0x18b   :  { %v720_v14 = vadd.f32 %v719_v11, %v637_v4  ;;  %1513 = vmatpush.msrb.mxu3 %v2384_v52  ;;  %1536 = vmatpush.msra.mxu2 %v2395_v59  ;;  %v1571_v52 = vsub.f32 %v2411_v3, %v1570_v51  ;;  %v1889_v7 = vsub.f32 %v1887_v57, %v1888_v60 }
 0x18c   :  { %1831 = vmatpush.msra.mxu1 %v2434_v20 }
 0x18d   :  { %v1853_v19 = vand.u32 4294901760, %v720_v14  ;;  %1515 = vmatpush.msrb.mxu3 %v2389_v18  ;;  %1538 = vmatpush.msra.mxu2 %v2398_v62  ;;  %v1572_v18 = vand.u32 4294901760, %v1571_v52  ;;  %v1890_v48 = vand.u32 4294901760, %v1889_v7 }
 0x18e   :  { %1833 = vmatpush.msra.mxu1 %v2425_v12 }
 0x18f   :  { %v1881_v23 = vsub.f32 %v720_v14, %v1853_v19  ;;  %1734 = vmatmul.f32.vlgmr.msrb.gmra.mxu1 %v2292_v50  ;;  %1812 = vmatmul.f32.vlgmr.msra.gmra.mxu0 %v2292_v50 }
 0x190   :  { %1938 = vmatpush.msrb.mxu1 %v1853_v19 }
 0x191   :  { %1913 = vmatpush.msrb.mxu0 %v1881_v23  ;;  %v1882_v49 = vand.u32 4294901760, %v1881_v23 }
 0x192   :  { %1940 = vmatpush.msrb.mxu1 %v1855_v53  ;;  %1467 = vmatmul.f32.vlgmr.msra.gmra.mxu3 %v2302_v0 }
 0x193   :  { %1494 = vmatmul.f32.vlgmr.msrb.gmra.mxu2 %v2292_v50  ;;  %1567 = vmatpush.msra.mxu3 %v1566_v41  ;;  %v1883_v29 = vsub.f32 %v1881_v23, %v1882_v49 }
 0x194   :  { %1647 = vmatpush.msrb.mxu2 %v1564_v61  ;;  %1916 = vmatpush.msrb.mxu0 %v1887_v57 }
 0x195   :  { %1573 = vmatpush.msra.mxu3 %v1572_v18 }
 0x196   :  { %1651 = vmatpush.msrb.mxu2 %v1570_v51 }
 0x197   :  { %1835 = vmatmul.f32.vlgmr.msra.gmra.mxu1 %v2292_v50  ;;  %1919 = vmatmul.f32.vlgmr.msrb.gmra.mxu0 %v2297_v58 }
 0x19a   :  { %1517 = vmatmul.f32.vlgmr.msrb.gmra.mxu3 %v2292_v50 }
 0x19b   :  { %1544 = vmatmul.f32.vlgmr.msra.gmra.mxu2 %v2308_v30  ;;  %1672 = vmatpush.msrb.mxu3 %v2395_v59 }
 0x19c   :  { %1754 = vmatpush.msra.mxu2 %v2438_v32 }
 0x19d   :  { %1674 = vmatpush.msrb.mxu3 %v2398_v62  ;;  %v1884_v62 = vand.u32 4294901760, %v1883_v29 }
 0x19e   :  { %1757 = vmatpush.msra.mxu2 %v2431_v8 }
 0x19f   :  { %1944 = vmatmul.f32.vlgmr.msrb.gmra.mxu1 %v2302_v0 }
 0x1a2   :  { %1575 = vmatmul.f32.vlgmr.msra.gmra.mxu3 %v2292_v50 }
 0x1a3   :  { %1653 = vmatmul.f32.vlgmr.msrb.gmra.mxu2 %v2292_v50  ;;  %1779 = vmatpush.msra.mxu3 %v2434_v20 }
 0x1a4   :  { %1854 = vmatpush.msrb.mxu2 %v1853_v19 }
 0x1a5   :  { %1781 = vmatpush.msra.mxu3 %v2425_v12  ;;  %v750_v59 = vpop.f32.mrf.mxu2 }
 0x1a6   :  { %1856 = vmatpush.msrb.mxu2 %v1855_v53 }
 0x1aa   :  { %1676 = vmatmul.f32.vlgmr.msrb.gmra.mxu3 %v2292_v50 }
 0x1ab   :  { %1760 = vmatmul.f32.vlgmr.msra.gmra.mxu2 %v2297_v58  ;;  %1885 = vmatpush.msrb.mxu3 %v1884_v62 }
 0x1ac   :  { %1965 = vmatpush.msra.mxu2 %v1882_v49 }
 0x1ad   :  { %1891 = vmatpush.msrb.mxu3 %v1890_v48  ;;  %v781_v15 = vpop.f32.mrf.mxu3  ;;  %v807_v16 = vpop.f32.mrf.mxu2 }
 0x1ae   :  { %1969 = vmatpush.msra.mxu2 %v1888_v60  ;;  %v782_v1 = vadd.f32 %v781_v15, %v750_v59 }
 0x1b0   :  { %v808_v6 = vadd.f32 %v807_v16, %v782_v1 }
 0x1b2   :  { %1785 = vmatmul.f32.vlgmr.msra.gmra.mxu3 %v2302_v0 }
 0x1b3   :  { %1990 = vmatpush.msra.mxu3 %v1853_v19  ;;  %1862 = vmatmul.f32.vlgmr.msrb.gmra.mxu2 %v2308_v30 }
 0x1b5   :  { %1992 = vmatpush.msra.mxu3 %v1855_v53  ;;  %v832_v3 = vpop.f32.mrf.mxu3  ;;  %v859_v55 = vpop.f32.mrf.mxu2 }
 0x1b6   :  { %v833_v9 = vadd.f32 %v832_v3, %v808_v6 }
 0x1b8   :  { %v860_v58 = vadd.f32 %v859_v55, %v833_v9 }
 0x1ba   :  { %1893 = vmatmul.f32.vlgmr.msrb.gmra.mxu3 %v2292_v50 }
 0x1bb   :  { %1971 = vmatmul.f32.vlgmr.msra.gmra.mxu2 %v2292_v50 }
 0x1bd   :  { %v882_v56 = vpop.f32.mrf.mxu3  ;;  %v909_v25 = vpop.f32.mrf.mxu2 }
 0x1be   :  { %v883_v26 = vadd.f32 %v882_v56, %v860_v58 }
 0x1c0   :  { %1999 = vst.msk [vmem:[#allocation5] sm:$0xff] %vm1998_vm1, %v883_v26 }
 0x1c2   :  { %1994 = vmatmul.f32.vlgmr.msra.gmra.mxu3 %v2292_v50 }
 0x1c5   :  { %v940_v0 = vpop.f32.mrf.mxu3  ;;  %v966_v30 = vpop.f32.mrf.mxu2 }
 0x1c6   :  { %v941_v34 = vadd.f32 %v940_v0, %v909_v25 }
 0x1c8   :  { %v967_v17 = vadd.f32 %v966_v30, %v941_v34 }
 0x1cd   :  { %v991_v12 = vpop.f32.mrf.mxu3  ;;  %v1018_v5 = vpop.f32.mrf.mxu2 }
 0x1ce   :  { %v992_v13 = vadd.f32 %v991_v12, %v967_v17 }
 0x1d0   :  { %v1019_v2 = vadd.f32 %v1018_v5, %v992_v13 }
 0x1d5   :  { %v1041_v31 = vpop.f32.mrf.mxu3  ;;  %v1068_v63 = vpop.f32.mrf.mxu2 }
 0x1d6   :  { %v1042_v8 = vadd.f32 %v1041_v31, %v1019_v2 }
 0x1d8   :  { %2000 = vst.msk [vmem:[#allocation5 + $0x8] sm:$0xff] %vm1998_vm1, %v1042_v8 }
 0x1dd   :  { %v1099_v47 = vpop.f32.mrf.mxu3  ;;  %v1125_v22 = vpop.f32.mrf.mxu2 }
 0x1de   :  { %v1100_v20 = vadd.f32 %v1099_v47, %v1068_v63 }
 0x1e0   :  { %v1126_v21 = vadd.f32 %v1125_v22, %v1100_v20 }
 0x1e5   :  { %v1150_v32 = vpop.f32.mrf.mxu3  ;;  %v1177_v40 = vpop.f32.mrf.mxu2 }
 0x1e6   :  { %v1151_v50 = vadd.f32 %v1150_v32, %v1126_v21 }
 0x1e8   :  { %v1178_v35 = vadd.f32 %v1177_v40, %v1151_v50 }
 0x1ed   :  { %v1200_v38 = vpop.f32.mrf.mxu3  ;;  %v1227_v36 = vpop.f32.mrf.mxu2 }
 0x1ee   :  { %v1201_v42 = vadd.f32 %v1200_v38, %v1178_v35 }
 0x1f0   :  { %2001 = vst.msk [vmem:[#allocation5 + $0x10] sm:$0xff] %vm1998_vm1, %v1201_v42 }
 0x1f1   :  { %v1627_v18 = vpop.f32.mrf.mxu1 }
 0x1f3   :  { %v1602_v57 = vpop.f32.mrf.mxu0 }
 0x1f5   :  { %v1258_v28 = vpop.f32.mrf.mxu3  ;;  %v1284_v43 = vpop.f32.mrf.mxu2 }
 0x1f6   :  { %v1259_v39 = vadd.f32 %v1258_v28, %v1227_v36 }
 0x1f8   :  { %v1285_v10 = vadd.f32 %v1284_v43, %v1259_v39 }
 0x1fd   :  { %v1309_v54 = vpop.f32.mrf.mxu3  ;;  %v1336_v24 = vpop.f32.mrf.mxu2 }
 0x1fe   :  { %v1310_v27 = vadd.f32 %v1309_v54, %v1285_v10 }
 0x200   :  { %v1337_v44 = vadd.f32 %v1336_v24, %v1310_v27 }
 0x204   :  { %v1704_v7 = vpop.f32.mrf.mxu0 }
 0x205   :  { %v1359_v45 = vpop.f32.mrf.mxu3  ;;  %v1386_v46 = vpop.f32.mrf.mxu2 }
 0x206   :  { %v1360_v61 = vadd.f32 %v1359_v45, %v1337_v44 }
 0x208   :  { %2002 = vst.msk [vmem:[#allocation5 + $0x18] sm:$0xff] %vm1998_vm1, %v1360_v61 }
 0x20c   :  { %v1735_v16 = vpop.f32.mrf.mxu1  ;;  %v1813_v6 = vpop.f32.mrf.mxu0 }
 0x20d   :  { %v1417_v4 = vpop.f32.mrf.mxu3  ;;  %v1443_v37 = vpop.f32.mrf.mxu2  ;;  %v1736_v55 = vadd.f32 %v1735_v16, %v1704_v7 }
 0x20e   :  { %v1418_v11 = vadd.f32 %v1417_v4, %v1386_v46 }
 0x210   :  { %v1444_v51 = vadd.f32 %v1443_v37, %v1418_v11 }
 0x214   :  { %v1836_v56 = vpop.f32.mrf.mxu1  ;;  %v1920_v12 = vpop.f32.mrf.mxu0 }
 0x215   :  { %v1468_v14 = vpop.f32.mrf.mxu3 }
 0x216   :  { %v1495_v33 = vpop.f32.mrf.mxu2  ;;  %v1469_v19 = vadd.f32 %v1468_v14, %v1444_v51 }
 0x218   :  { %v1496_v53 = vadd.f32 %v1495_v33, %v1469_v19 }
 0x21c   :  { %v1945_v17 = vpop.f32.mrf.mxu1 }
 0x21d   :  { %v1518_v23 = vpop.f32.mrf.mxu3 }
 0x21e   :  { %v1519_v52 = vadd.f32 %v1518_v23, %v1496_v53  ;;  %v1545_v41 = vpop.f32.mrf.mxu2 }
 0x220   :  { %2003 = vst.msk [vmem:[#allocation5 + $0x20] sm:$0xff] %vm1998_vm1, %v1519_v52 }
 0x225   :  { %v1576_v49 = vpop.f32.mrf.mxu3 }
 0x226   :  { %v1577_v60 = vadd.f32 %v1576_v49, %v1545_v41  ;;  %v1654_v29 = vpop.f32.mrf.mxu2 }
 0x228   :  { %v1603_v59 = vadd.f32 %v1602_v57, %v1577_v60 }
 0x22a   :  { %v1628_v62 = vadd.f32 %v1627_v18, %v1603_v59 }
 0x22c   :  { %v1655_v48 = vadd.f32 %v1654_v29, %v1628_v62 }
 0x22d   :  { %v1677_v15 = vpop.f32.mrf.mxu3 }
 0x22e   :  { %v1678_v1 = vadd.f32 %v1677_v15, %v1655_v48  ;;  %v1761_v3 = vpop.f32.mrf.mxu2 }
 0x22f   :  { %v1762_v9 = vadd.f32 %v1761_v3, %v1736_v55 }
 0x230   :  { %2004 = vst.msk [vmem:[#allocation5 + $0x28] sm:$0xff] %vm1998_vm1, %v1678_v1 }
 0x235   :  { %v1786_v58 = vpop.f32.mrf.mxu3 }
 0x236   :  { %v1787_v25 = vadd.f32 %v1786_v58, %v1762_v9  ;;  %v1863_v26 = vpop.f32.mrf.mxu2 }
 0x238   :  { %v1814_v0 = vadd.f32 %v1813_v6, %v1787_v25 }
 0x23a   :  { %v1837_v30 = vadd.f32 %v1836_v56, %v1814_v0 }
 0x23c   :  { %2005 = vst.msk [vmem:[#allocation5 + $0x30] sm:$0xff] %vm1998_vm1, %v1837_v30 }
 0x23d   :  { %v1894_v34 = vpop.f32.mrf.mxu3 }
 0x23e   :  { %v1895_v5 = vadd.f32 %v1894_v34, %v1863_v26  ;;  %v1972_v2 = vpop.f32.mrf.mxu2 }
 0x240   :  { %v1921_v13 = vadd.f32 %v1920_v12, %v1895_v5 }
 0x242   :  { %v1946_v31 = vadd.f32 %v1945_v17, %v1921_v13 }
 0x244   :  { %v1973_v63 = vadd.f32 %v1972_v2, %v1946_v31 }
 0x245   :  { %v1995_v8 = vpop.f32.mrf.mxu3 }
 0x246   :  { %v1996_v47 = vadd.f32 %v1995_v8, %v1973_v63 }
 0x248   :  { %2006 = vst.msk [vmem:[#allocation5 + $0x38] sm:$0xff] %vm1998_vm1, %v1996_v47 }
 0x249   :  { %2019 = dma.vmem_to_hbm [thread:$0]  %s2012_s23, 1024, %s2014_s26, [#allocation4], %s2083_s17, %s2083_s17, %s2084_s18  }
 0x24a   :  { %2080 = dma.done.wait [#allocation4], 1024  }
 0x24b   :  { %2081 = vsyncadd [#allocation4], 4294966272 }
 0x24c   :  { %2024 = vsyncpa [#allocation3], 1 }
 0x24d   :  { %2025 = vsyncpa [#allocation4], 1 }

</bundles_post_ra>
